<compile_context>
chip_gen: v7x
topology: tpu7x:2x2x1
jax: 0.10.0
libtpu: 0.0.40
codegen_flags: <defaults>
</compile_context>

<pallas_src>
import functools

import jax
import jax.numpy as jnp
from jax.experimental import pallas as pl
from jax.experimental.pallas import tpu as pltpu

LEAK = 0.2     # nn.LeakyReLU(0.2)
EPS = 1e-5     # nn.LayerNorm default eps


def _basic_linear(x, w, b, gamma, beta):
    """Linear -> LayerNorm -> LeakyReLU(0.2) on a (TM, feat) slab.

    x / w are bf16 (MXU operands), accumulation and LayerNorm math are f32.
    """
    y = jnp.dot(x, w, preferred_element_type=jnp.float32) + b
    inv_n = 1.0 / y.shape[-1]
    mean = jnp.sum(y, axis=-1, keepdims=True) * inv_n
    meansq = jnp.sum(y * y, axis=-1, keepdims=True) * inv_n
    var = jnp.maximum(meansq - mean * mean, 0.0)      # biased variance, like torch
    yn = (y - mean) * jax.lax.rsqrt(var + EPS)
    yn = yn * gamma + beta
    # LeakyReLU(0.2): for 0 < LEAK < 1 this is exactly max(yn, LEAK*yn) (mul+max).
    return jnp.maximum(yn, LEAK * yn)


def bodyreg_kernel(x_ref,
                   w1_ref, b1_ref, g1_ref, be1_ref,
                   w2_ref, b2_ref, g2_ref, be2_ref,
                   w3_ref, b3_ref, g3_ref, be3_ref,
                   w4_ref, b4_ref, g4_ref, be4_ref,
                   o_ref):
    bf16 = jnp.bfloat16
    h = _basic_linear(x_ref[...], w1_ref[...], b1_ref[...], g1_ref[...], be1_ref[...])   # (TM, 64)
    # Layer-2 params are column-permuted (even features first, odd second), so
    # MaxPool1d(2, stride=2) over 256 features is a tile-aligned half-split max.
    h = _basic_linear(h.astype(bf16), w2_ref[...], b2_ref[...], g2_ref[...], be2_ref[...])  # (TM, 256)
    h = jnp.maximum(h[:, :128], h[:, 128:])                                                 # (TM, 128)
    h = _basic_linear(h.astype(bf16), w3_ref[...], b3_ref[...], g3_ref[...], be3_ref[...])  # (TM, 128)
    # Layer-4 params are column-permuted the same way -> AvgPool1d(2, stride=2)
    # is a half-split add.
    h = _basic_linear(h.astype(bf16), w4_ref[...], b4_ref[...], g4_ref[...], be4_ref[...])  # (TM, 128)
    out = 0.5 * (h[:, :64] + h[:, 64:])                                                     # (TM, 64)
    o_ref[...] = out.astype(o_ref.dtype)


def _round_up(x, m):
    return ((x + m - 1) // m) * m


def _choose_tm(M, tm):
    """Row-tile size: multiple of 8, and capped so the grid has >= 2 steps
    (keeps both v7x TensorCores busy; harmless on v5e/v6e)."""
    if M <= 8:
        return M                       # full extent is always a legal block dim
    half = _round_up((M + 1) // 2, 8)  # guarantees >= 2 grid iterations
    return max(8, min(_round_up(tm, 8), half))


def init_params(key, infeat):
    """Deterministic synthetic params: (W, b, gamma, beta) for each basic_linear."""
    sizes = [(infeat, 64), (64, 256), (128, 128), (128, 128)]
    params = []
    for i, (fin, fout) in enumerate(sizes):
        k = jax.random.fold_in(key, i)
        kw, kb = jax.random.split(k)
        w = jax.random.normal(kw, (fin, fout), jnp.float32) / jnp.sqrt(float(fin))
        b = 0.01 * jax.random.normal(kb, (fout,), jnp.float32)
        gamma = jnp.ones((fout,), jnp.float32)
        beta = jnp.zeros((fout,), jnp.float32)
        params.append((w, b, gamma, beta))
    return params


@functools.partial(jax.jit, static_argnames=("tm", "out_dtype"))
def bodyreg_branch(x, params, *, tm=1024, out_dtype=jnp.float32):
    B, S, F = x.shape
    M = B * S
    # bf16 MXU operand: halves the streamed x bytes; no padding copies.
    x2 = x.reshape(M, F).astype(jnp.bfloat16)

    (w1, b1, g1, be1), (w2, b2, g2, be2), (w3, b3, g3, be3), (w4, b4, g4, be4) = params

    # Fold the pair-pools into column permutations of the preceding layer's
    # params (LayerNorm over all features is permutation invariant): even
    # original feature indices land in the first half, odd in the second.
    perm256 = jnp.concatenate([jnp.arange(0, 256, 2), jnp.arange(1, 256, 2)])
    perm128 = jnp.concatenate([jnp.arange(0, 128, 2), jnp.arange(1, 128, 2)])
    w2p, b2p, g2p, be2p = w2[:, perm256], b2[perm256], g2[perm256], be2[perm256]
    w4p, b4p, g4p, be4p = w4[:, perm128], b4[perm128], g4[perm128], be4[perm128]

    bf16 = jnp.bfloat16
    row = lambda v: v.reshape(1, -1).astype(jnp.float32)
    consts = [
        w1.astype(bf16), row(b1), row(g1), row(be1),
        w2p.astype(bf16), row(b2p), row(g2p), row(be2p),
        w3.astype(bf16), row(b3), row(g3), row(be3),
        w4p.astype(bf16), row(b4p), row(g4p), row(be4p),
    ]
    const_specs = [pl.BlockSpec(c.shape, lambda i: (0, 0)) for c in consts]

    tm_eff = _choose_tm(M, tm)
    grid = (pl.cdiv(M, tm_eff),)   # partial last tile: reads are don't-care rows,
                                   # writes past M are masked by Pallas.

    cp_kwargs = dict(dimension_semantics=("parallel",))
    if tm_eff >= 2048:
        cp_kwargs["vmem_limit_bytes"] = 64 * 1024 * 1024

    out = pl.pallas_call(
        bodyreg_kernel,
        out_shape=jax.ShapeDtypeStruct((M, 64), out_dtype),
        grid=grid,
        in_specs=[pl.BlockSpec((tm_eff, F), lambda i: (i, 0))] + const_specs,
        out_specs=pl.BlockSpec((tm_eff, 64), lambda i: (i, 0)),
        compiler_params=pltpu.CompilerParams(**cp_kwargs),
    )(x2, *consts)

    return out.reshape(B, S, 64)


# ---------------- pure-JAX reference (mirrors the PyTorch module) ----------------
def _ref_basic_linear(x, w, b, gamma, beta):
    y = jnp.dot(x, w) + b
    mean = jnp.mean(y, axis=-1, keepdims=True)
    var = jnp.mean((y - mean) ** 2, axis=-1, keepdims=True)
    yn = (y - mean) / jnp.sqrt(var + EPS)
    yn = yn * gamma + beta
    return jnp.where(yn >= 0.0, yn, LEAK * yn)


def bodyreg_branch_ref(x, params):
    h = _ref_basic_linear(x, *params[0])
    h = _ref_basic_linear(h, *params[1])
    h = jnp.max(h.reshape(*h.shape[:-1], 128, 2), axis=-1)      # MaxPool1d(2, 2)
    h = _ref_basic_linear(h, *params[2])
    h = _ref_basic_linear(h, *params[3])
    h = jnp.mean(h.reshape(*h.shape[:-1], 64, 2), axis=-1)      # AvgPool1d(2, 2)
    return h


if __name__ == "__main__":
    B, S, INFEAT = 2, 8, 32
    key = jax.random.PRNGKey(0)
    kx, kp = jax.random.split(key)
    x = jax.random.normal(kx, (B, S, INFEAT), jnp.float32)
    params = init_params(kp, INFEAT)

    out = jax.block_until_ready(bodyreg_branch(x, params))
    ref = jax.block_until_ready(bodyreg_branch_ref(x, params))

    assert out.shape == (B, S, 64)
    # Kernel uses explicit bf16 MXU operands; reference uses default (bf16-pass)
    # matmul precision with f32 activations. LayerNorm re-centers each layer, so
    # drift stays small; a modest tolerance still catches real bugs.
    max_err = float(jnp.max(jnp.abs(out - ref)))
    assert jnp.allclose(out, ref, rtol=2e-2, atol=2e-2), max_err

    print("KERNEL_OK")
</pallas_src>

<mosaic_0001>
module attributes {stable_mosaic.version = 11 : i64} {
  func.func @bodyreg_kernel(%arg0: i32, %arg1: memref<8x32xbf16, #tpu.memory_space<vmem>>, %arg2: memref<32x64xbf16, #tpu.memory_space<vmem>>, %arg3: memref<1x64xf32, #tpu.memory_space<vmem>>, %arg4: memref<1x64xf32, #tpu.memory_space<vmem>>, %arg5: memref<1x64xf32, #tpu.memory_space<vmem>>, %arg6: memref<64x256xbf16, #tpu.memory_space<vmem>>, %arg7: memref<1x256xf32, #tpu.memory_space<vmem>>, %arg8: memref<1x256xf32, #tpu.memory_space<vmem>>, %arg9: memref<1x256xf32, #tpu.memory_space<vmem>>, %arg10: memref<128x128xbf16, #tpu.memory_space<vmem>>, %arg11: memref<1x128xf32, #tpu.memory_space<vmem>>, %arg12: memref<1x128xf32, #tpu.memory_space<vmem>>, %arg13: memref<1x128xf32, #tpu.memory_space<vmem>>, %arg14: memref<128x128xbf16, #tpu.memory_space<vmem>>, %arg15: memref<1x128xf32, #tpu.memory_space<vmem>>, %arg16: memref<1x128xf32, #tpu.memory_space<vmem>>, %arg17: memref<1x128xf32, #tpu.memory_space<vmem>>, %arg18: memref<8x64xf32, #tpu.memory_space<vmem>>) attributes {dimension_semantics = [#tpu.dimension_semantics<parallel>], iteration_bounds = array<i64: 2>, scalar_prefetch = 0 : i64, scratch_operands = 0 : i64, tpu.core_type = #tpu.core_type<tc>, window_params = [{transform_indices = @transform_0, window_bounds = array<i64: 8, 32>}, {pipeline_mode = #tpu.pipeline_mode<synchronous>, transform_indices = @transform_1, window_bounds = array<i64: 32, 64>}, {pipeline_mode = #tpu.pipeline_mode<synchronous>, transform_indices = @transform_2, window_bounds = array<i64: 1, 64>}, {pipeline_mode = #tpu.pipeline_mode<synchronous>, transform_indices = @transform_3, window_bounds = array<i64: 1, 64>}, {pipeline_mode = #tpu.pipeline_mode<synchronous>, transform_indices = @transform_4, window_bounds = array<i64: 1, 64>}, {pipeline_mode = #tpu.pipeline_mode<synchronous>, transform_indices = @transform_5, window_bounds = array<i64: 64, 256>}, {pipeline_mode = #tpu.pipeline_mode<synchronous>, transform_indices = @transform_6, window_bounds = array<i64: 1, 256>}, {pipeline_mode = #tpu.pipeline_mode<synchronous>, transform_indices = @transform_7, window_bounds = array<i64: 1, 256>}, {pipeline_mode = #tpu.pipeline_mode<synchronous>, transform_indices = @transform_8, window_bounds = array<i64: 1, 256>}, {pipeline_mode = #tpu.pipeline_mode<synchronous>, transform_indices = @transform_9, window_bounds = array<i64: 128, 128>}, {pipeline_mode = #tpu.pipeline_mode<synchronous>, transform_indices = @transform_10, window_bounds = array<i64: 1, 128>}, {pipeline_mode = #tpu.pipeline_mode<synchronous>, transform_indices = @transform_11, window_bounds = array<i64: 1, 128>}, {pipeline_mode = #tpu.pipeline_mode<synchronous>, transform_indices = @transform_12, window_bounds = array<i64: 1, 128>}, {pipeline_mode = #tpu.pipeline_mode<synchronous>, transform_indices = @transform_13, window_bounds = array<i64: 128, 128>}, {pipeline_mode = #tpu.pipeline_mode<synchronous>, transform_indices = @transform_14, window_bounds = array<i64: 1, 128>}, {pipeline_mode = #tpu.pipeline_mode<synchronous>, transform_indices = @transform_15, window_bounds = array<i64: 1, 128>}, {pipeline_mode = #tpu.pipeline_mode<synchronous>, transform_indices = @transform_16, window_bounds = array<i64: 1, 128>}, {transform_indices = @transform_17, window_bounds = array<i64: 8, 64>}]} {
    %c0 = arith.constant 0 : index
    %c0_0 = arith.constant 0 : index
    %0 = vector.load %arg1[%c0, %c0_0] : memref<8x32xbf16, #tpu.memory_space<vmem>>, vector<8x32xbf16>
    %c0_1 = arith.constant 0 : index
    %c0_2 = arith.constant 0 : index
    %1 = vector.load %arg2[%c0_1, %c0_2] : memref<32x64xbf16, #tpu.memory_space<vmem>>, vector<32x64xbf16>
    %c0_3 = arith.constant 0 : index
    %c0_4 = arith.constant 0 : index
    %2 = vector.load %arg3[%c0_3, %c0_4] : memref<1x64xf32, #tpu.memory_space<vmem>>, vector<1x64xf32>
    %c0_5 = arith.constant 0 : index
    %c0_6 = arith.constant 0 : index
    %3 = vector.load %arg4[%c0_5, %c0_6] : memref<1x64xf32, #tpu.memory_space<vmem>>, vector<1x64xf32>
    %c0_7 = arith.constant 0 : index
    %c0_8 = arith.constant 0 : index
    %4 = vector.load %arg5[%c0_7, %c0_8] : memref<1x64xf32, #tpu.memory_space<vmem>>, vector<1x64xf32>
    %cst = arith.constant dense<0.000000e+00> : vector<8x64xf32>
    %5 = tpu.matmul %0, %1, %cst {dimension_numbers = #tpu.dot_dimension_numbers<[1], [0], [0], [1], [0, 0, 1, 1], [], []>} : vector<8x32xbf16>, vector<32x64xbf16>, vector<8x64xf32> -> vector<8x64xf32>
    %6 = vector.broadcast %2 : vector<1x64xf32> to vector<8x64xf32>
    %7 = arith.addf %5, %6 : vector<8x64xf32>
    %cst_9 = arith.constant dense<0.000000e+00> : vector<8xf32>
    %8 = vector.multi_reduction <add>, %7, %cst_9 [1] : vector<8x64xf32> to vector<8xf32>
    %9 = vector.shape_cast %8 : vector<8xf32> to vector<8x1xf32>
    %cst_10 = arith.constant 1.562500e-02 : f32
    %10 = vector.broadcast %cst_10 : f32 to vector<8x1xf32>
    %11 = arith.mulf %9, %10 : vector<8x1xf32>
    %12 = arith.mulf %7, %7 : vector<8x64xf32>
    %cst_11 = arith.constant dense<0.000000e+00> : vector<8xf32>
    %13 = vector.multi_reduction <add>, %12, %cst_11 [1] : vector<8x64xf32> to vector<8xf32>
    %14 = vector.shape_cast %13 : vector<8xf32> to vector<8x1xf32>
    %cst_12 = arith.constant 1.562500e-02 : f32
    %15 = vector.broadcast %cst_12 : f32 to vector<8x1xf32>
    %16 = arith.mulf %14, %15 : vector<8x1xf32>
    %17 = arith.mulf %11, %11 : vector<8x1xf32>
    %18 = arith.subf %16, %17 : vector<8x1xf32>
    %cst_13 = arith.constant 0.000000e+00 : f32
    %19 = vector.broadcast %cst_13 : f32 to vector<8x1xf32>
    %20 = arith.maximumf %18, %19 : vector<8x1xf32>
    %21 = vector.broadcast %11 : vector<8x1xf32> to vector<8x64xf32>
    %22 = arith.subf %7, %21 : vector<8x64xf32>
    %cst_14 = arith.constant 9.99999974E-6 : f32
    %23 = vector.broadcast %cst_14 : f32 to vector<8x1xf32>
    %24 = arith.addf %20, %23 : vector<8x1xf32>
    %25 = math.rsqrt %24 : vector<8x1xf32>
    %26 = vector.broadcast %25 : vector<8x1xf32> to vector<8x64xf32>
    %27 = arith.mulf %22, %26 : vector<8x64xf32>
    %28 = vector.broadcast %3 : vector<1x64xf32> to vector<8x64xf32>
    %29 = arith.mulf %27, %28 : vector<8x64xf32>
    %30 = vector.broadcast %4 : vector<1x64xf32> to vector<8x64xf32>
    %31 = arith.addf %29, %30 : vector<8x64xf32>
    %cst_15 = arith.constant 2.000000e-01 : f32
    %32 = vector.broadcast %cst_15 : f32 to vector<8x64xf32>
    %33 = arith.mulf %32, %31 : vector<8x64xf32>
    %34 = arith.maximumf %31, %33 : vector<8x64xf32>
    %35 = arith.truncf %34 : vector<8x64xf32> to vector<8x64xbf16>
    %c0_16 = arith.constant 0 : index
    %c0_17 = arith.constant 0 : index
    %36 = vector.load %arg6[%c0_16, %c0_17] : memref<64x256xbf16, #tpu.memory_space<vmem>>, vector<64x256xbf16>
    %c0_18 = arith.constant 0 : index
    %c0_19 = arith.constant 0 : index
    %37 = vector.load %arg7[%c0_18, %c0_19] : memref<1x256xf32, #tpu.memory_space<vmem>>, vector<1x256xf32>
    %c0_20 = arith.constant 0 : index
    %c0_21 = arith.constant 0 : index
    %38 = vector.load %arg8[%c0_20, %c0_21] : memref<1x256xf32, #tpu.memory_space<vmem>>, vector<1x256xf32>
    %c0_22 = arith.constant 0 : index
    %c0_23 = arith.constant 0 : index
    %39 = vector.load %arg9[%c0_22, %c0_23] : memref<1x256xf32, #tpu.memory_space<vmem>>, vector<1x256xf32>
    %cst_24 = arith.constant dense<0.000000e+00> : vector<8x256xf32>
    %40 = tpu.matmul %35, %36, %cst_24 {dimension_numbers = #tpu.dot_dimension_numbers<[1], [0], [0], [1], [0, 0, 1, 1], [], []>} : vector<8x64xbf16>, vector<64x256xbf16>, vector<8x256xf32> -> vector<8x256xf32>
    %41 = vector.broadcast %37 : vector<1x256xf32> to vector<8x256xf32>
    %42 = arith.addf %40, %41 : vector<8x256xf32>
    %cst_25 = arith.constant dense<0.000000e+00> : vector<8xf32>
    %43 = vector.multi_reduction <add>, %42, %cst_25 [1] : vector<8x256xf32> to vector<8xf32>
    %44 = vector.shape_cast %43 : vector<8xf32> to vector<8x1xf32>
    %cst_26 = arith.constant 3.906250e-03 : f32
    %45 = vector.broadcast %cst_26 : f32 to vector<8x1xf32>
    %46 = arith.mulf %44, %45 : vector<8x1xf32>
    %47 = arith.mulf %42, %42 : vector<8x256xf32>
    %cst_27 = arith.constant dense<0.000000e+00> : vector<8xf32>
    %48 = vector.multi_reduction <add>, %47, %cst_27 [1] : vector<8x256xf32> to vector<8xf32>
    %49 = vector.shape_cast %48 : vector<8xf32> to vector<8x1xf32>
    %cst_28 = arith.constant 3.906250e-03 : f32
    %50 = vector.broadcast %cst_28 : f32 to vector<8x1xf32>
    %51 = arith.mulf %49, %50 : vector<8x1xf32>
    %52 = arith.mulf %46, %46 : vector<8x1xf32>
    %53 = arith.subf %51, %52 : vector<8x1xf32>
    %cst_29 = arith.constant 0.000000e+00 : f32
    %54 = vector.broadcast %cst_29 : f32 to vector<8x1xf32>
    %55 = arith.maximumf %53, %54 : vector<8x1xf32>
    %56 = vector.broadcast %46 : vector<8x1xf32> to vector<8x256xf32>
    %57 = arith.subf %42, %56 : vector<8x256xf32>
    %cst_30 = arith.constant 9.99999974E-6 : f32
    %58 = vector.broadcast %cst_30 : f32 to vector<8x1xf32>
    %59 = arith.addf %55, %58 : vector<8x1xf32>
    %60 = math.rsqrt %59 : vector<8x1xf32>
    %61 = vector.broadcast %60 : vector<8x1xf32> to vector<8x256xf32>
    %62 = arith.mulf %57, %61 : vector<8x256xf32>
    %63 = vector.broadcast %38 : vector<1x256xf32> to vector<8x256xf32>
    %64 = arith.mulf %62, %63 : vector<8x256xf32>
    %65 = vector.broadcast %39 : vector<1x256xf32> to vector<8x256xf32>
    %66 = arith.addf %64, %65 : vector<8x256xf32>
    %cst_31 = arith.constant 2.000000e-01 : f32
    %67 = vector.broadcast %cst_31 : f32 to vector<8x256xf32>
    %68 = arith.mulf %67, %66 : vector<8x256xf32>
    %69 = arith.maximumf %66, %68 : vector<8x256xf32>
    %70 = vector.extract_strided_slice %69 {offsets = [0, 0], sizes = [8, 128], strides = [1, 1]} : vector<8x256xf32> to vector<8x128xf32>
    %71 = vector.extract_strided_slice %69 {offsets = [0, 128], sizes = [8, 128], strides = [1, 1]} : vector<8x256xf32> to vector<8x128xf32>
    %72 = arith.maximumf %70, %71 : vector<8x128xf32>
    %73 = arith.truncf %72 : vector<8x128xf32> to vector<8x128xbf16>
    %c0_32 = arith.constant 0 : index
    %c0_33 = arith.constant 0 : index
    %74 = vector.load %arg10[%c0_32, %c0_33] : memref<128x128xbf16, #tpu.memory_space<vmem>>, vector<128x128xbf16>
    %c0_34 = arith.constant 0 : index
    %c0_35 = arith.constant 0 : index
    %75 = vector.load %arg11[%c0_34, %c0_35] : memref<1x128xf32, #tpu.memory_space<vmem>>, vector<1x128xf32>
    %c0_36 = arith.constant 0 : index
    %c0_37 = arith.constant 0 : index
    %76 = vector.load %arg12[%c0_36, %c0_37] : memref<1x128xf32, #tpu.memory_space<vmem>>, vector<1x128xf32>
    %c0_38 = arith.constant 0 : index
    %c0_39 = arith.constant 0 : index
    %77 = vector.load %arg13[%c0_38, %c0_39] : memref<1x128xf32, #tpu.memory_space<vmem>>, vector<1x128xf32>
    %cst_40 = arith.constant dense<0.000000e+00> : vector<8x128xf32>
    %78 = tpu.matmul %73, %74, %cst_40 {dimension_numbers = #tpu.dot_dimension_numbers<[1], [0], [0], [1], [0, 0, 1, 1], [], []>} : vector<8x128xbf16>, vector<128x128xbf16>, vector<8x128xf32> -> vector<8x128xf32>
    %79 = vector.broadcast %75 : vector<1x128xf32> to vector<8x128xf32>
    %80 = arith.addf %78, %79 : vector<8x128xf32>
    %cst_41 = arith.constant dense<0.000000e+00> : vector<8xf32>
    %81 = vector.multi_reduction <add>, %80, %cst_41 [1] : vector<8x128xf32> to vector<8xf32>
    %82 = vector.shape_cast %81 : vector<8xf32> to vector<8x1xf32>
    %cst_42 = arith.constant 7.812500e-03 : f32
    %83 = vector.broadcast %cst_42 : f32 to vector<8x1xf32>
    %84 = arith.mulf %82, %83 : vector<8x1xf32>
    %85 = arith.mulf %80, %80 : vector<8x128xf32>
    %cst_43 = arith.constant dense<0.000000e+00> : vector<8xf32>
    %86 = vector.multi_reduction <add>, %85, %cst_43 [1] : vector<8x128xf32> to vector<8xf32>
    %87 = vector.shape_cast %86 : vector<8xf32> to vector<8x1xf32>
    %cst_44 = arith.constant 7.812500e-03 : f32
    %88 = vector.broadcast %cst_44 : f32 to vector<8x1xf32>
    %89 = arith.mulf %87, %88 : vector<8x1xf32>
    %90 = arith.mulf %84, %84 : vector<8x1xf32>
    %91 = arith.subf %89, %90 : vector<8x1xf32>
    %cst_45 = arith.constant 0.000000e+00 : f32
    %92 = vector.broadcast %cst_45 : f32 to vector<8x1xf32>
    %93 = arith.maximumf %91, %92 : vector<8x1xf32>
    %94 = vector.broadcast %84 : vector<8x1xf32> to vector<8x128xf32>
    %95 = arith.subf %80, %94 : vector<8x128xf32>
    %cst_46 = arith.constant 9.99999974E-6 : f32
    %96 = vector.broadcast %cst_46 : f32 to vector<8x1xf32>
    %97 = arith.addf %93, %96 : vector<8x1xf32>
    %98 = math.rsqrt %97 : vector<8x1xf32>
    %99 = vector.broadcast %98 : vector<8x1xf32> to vector<8x128xf32>
    %100 = arith.mulf %95, %99 : vector<8x128xf32>
    %101 = vector.broadcast %76 : vector<1x128xf32> to vector<8x128xf32>
    %102 = arith.mulf %100, %101 : vector<8x128xf32>
    %103 = vector.broadcast %77 : vector<1x128xf32> to vector<8x128xf32>
    %104 = arith.addf %102, %103 : vector<8x128xf32>
    %cst_47 = arith.constant 2.000000e-01 : f32
    %105 = vector.broadcast %cst_47 : f32 to vector<8x128xf32>
    %106 = arith.mulf %105, %104 : vector<8x128xf32>
    %107 = arith.maximumf %104, %106 : vector<8x128xf32>
    %108 = arith.truncf %107 : vector<8x128xf32> to vector<8x128xbf16>
    %c0_48 = arith.constant 0 : index
    %c0_49 = arith.constant 0 : index
    %109 = vector.load %arg14[%c0_48, %c0_49] : memref<128x128xbf16, #tpu.memory_space<vmem>>, vector<128x128xbf16>
    %c0_50 = arith.constant 0 : index
    %c0_51 = arith.constant 0 : index
    %110 = vector.load %arg15[%c0_50, %c0_51] : memref<1x128xf32, #tpu.memory_space<vmem>>, vector<1x128xf32>
    %c0_52 = arith.constant 0 : index
    %c0_53 = arith.constant 0 : index
    %111 = vector.load %arg16[%c0_52, %c0_53] : memref<1x128xf32, #tpu.memory_space<vmem>>, vector<1x128xf32>
    %c0_54 = arith.constant 0 : index
    %c0_55 = arith.constant 0 : index
    %112 = vector.load %arg17[%c0_54, %c0_55] : memref<1x128xf32, #tpu.memory_space<vmem>>, vector<1x128xf32>
    %cst_56 = arith.constant dense<0.000000e+00> : vector<8x128xf32>
    %113 = tpu.matmul %108, %109, %cst_56 {dimension_numbers = #tpu.dot_dimension_numbers<[1], [0], [0], [1], [0, 0, 1, 1], [], []>} : vector<8x128xbf16>, vector<128x128xbf16>, vector<8x128xf32> -> vector<8x128xf32>
    %114 = vector.broadcast %110 : vector<1x128xf32> to vector<8x128xf32>
    %115 = arith.addf %113, %114 : vector<8x128xf32>
    %cst_57 = arith.constant dense<0.000000e+00> : vector<8xf32>
    %116 = vector.multi_reduction <add>, %115, %cst_57 [1] : vector<8x128xf32> to vector<8xf32>
    %117 = vector.shape_cast %116 : vector<8xf32> to vector<8x1xf32>
    %cst_58 = arith.constant 7.812500e-03 : f32
    %118 = vector.broadcast %cst_58 : f32 to vector<8x1xf32>
    %119 = arith.mulf %117, %118 : vector<8x1xf32>
    %120 = arith.mulf %115, %115 : vector<8x128xf32>
    %cst_59 = arith.constant dense<0.000000e+00> : vector<8xf32>
    %121 = vector.multi_reduction <add>, %120, %cst_59 [1] : vector<8x128xf32> to vector<8xf32>
    %122 = vector.shape_cast %121 : vector<8xf32> to vector<8x1xf32>
    %cst_60 = arith.constant 7.812500e-03 : f32
    %123 = vector.broadcast %cst_60 : f32 to vector<8x1xf32>
    %124 = arith.mulf %122, %123 : vector<8x1xf32>
    %125 = arith.mulf %119, %119 : vector<8x1xf32>
    %126 = arith.subf %124, %125 : vector<8x1xf32>
    %cst_61 = arith.constant 0.000000e+00 : f32
    %127 = vector.broadcast %cst_61 : f32 to vector<8x1xf32>
    %128 = arith.maximumf %126, %127 : vector<8x1xf32>
    %129 = vector.broadcast %119 : vector<8x1xf32> to vector<8x128xf32>
    %130 = arith.subf %115, %129 : vector<8x128xf32>
    %cst_62 = arith.constant 9.99999974E-6 : f32
    %131 = vector.broadcast %cst_62 : f32 to vector<8x1xf32>
    %132 = arith.addf %128, %131 : vector<8x1xf32>
    %133 = math.rsqrt %132 : vector<8x1xf32>
    %134 = vector.broadcast %133 : vector<8x1xf32> to vector<8x128xf32>
    %135 = arith.mulf %130, %134 : vector<8x128xf32>
    %136 = vector.broadcast %111 : vector<1x128xf32> to vector<8x128xf32>
    %137 = arith.mulf %135, %136 : vector<8x128xf32>
    %138 = vector.broadcast %112 : vector<1x128xf32> to vector<8x128xf32>
    %139 = arith.addf %137, %138 : vector<8x128xf32>
    %cst_63 = arith.constant 2.000000e-01 : f32
    %140 = vector.broadcast %cst_63 : f32 to vector<8x128xf32>
    %141 = arith.mulf %140, %139 : vector<8x128xf32>
    %142 = arith.maximumf %139, %141 : vector<8x128xf32>
    %143 = vector.extract_strided_slice %142 {offsets = [0, 0], sizes = [8, 64], strides = [1, 1]} : vector<8x128xf32> to vector<8x64xf32>
    %144 = vector.extract_strided_slice %142 {offsets = [0, 64], sizes = [8, 64], strides = [1, 1]} : vector<8x128xf32> to vector<8x64xf32>
    %145 = arith.addf %143, %144 : vector<8x64xf32>
    %cst_64 = arith.constant 5.000000e-01 : f32
    %146 = vector.broadcast %cst_64 : f32 to vector<8x64xf32>
    %147 = arith.mulf %146, %145 : vector<8x64xf32>
    %c0_65 = arith.constant 0 : index
    %c0_66 = arith.constant 0 : index
    %148 = vector.load %arg18[%c0_65, %c0_66] : memref<8x64xf32, #tpu.memory_space<vmem>>, vector<8x64xf32>
    tpu.vector_store %arg18[%c0_65, %c0_66], %147 {strides = array<i32>} : memref<8x64xf32, #tpu.memory_space<vmem>>, vector<8x64xf32>,
    return
  }
  func.func @transform_0(%arg0: i32) -> (i32, i32) {
    %c0_i32 = arith.constant 0 : i32
    %c0_i32_0 = arith.constant 0 : i32
    return %arg0, %c0_i32 : i32, i32
  }
  func.func @transform_1(%arg0: i32) -> (i32, i32) {
    %c0_i32 = arith.constant 0 : i32
    %c0_i32_0 = arith.constant 0 : i32
    %c0_i32_1 = arith.constant 0 : i32
    return %c0_i32, %c0_i32_0 : i32, i32
  }
  func.func @transform_2(%arg0: i32) -> (i32, i32) {
    %c0_i32 = arith.constant 0 : i32
    %c0_i32_0 = arith.constant 0 : i32
    %c0_i32_1 = arith.constant 0 : i32
    return %c0_i32, %c0_i32_0 : i32, i32
  }
  func.func @transform_3(%arg0: i32) -> (i32, i32) {
    %c0_i32 = arith.constant 0 : i32
    %c0_i32_0 = arith.constant 0 : i32
    %c0_i32_1 = arith.constant 0 : i32
    return %c0_i32, %c0_i32_0 : i32, i32
  }
  func.func @transform_4(%arg0: i32) -> (i32, i32) {
    %c0_i32 = arith.constant 0 : i32
    %c0_i32_0 = arith.constant 0 : i32
    %c0_i32_1 = arith.constant 0 : i32
    return %c0_i32, %c0_i32_0 : i32, i32
  }
  func.func @transform_5(%arg0: i32) -> (i32, i32) {
    %c0_i32 = arith.constant 0 : i32
    %c0_i32_0 = arith.constant 0 : i32
    %c0_i32_1 = arith.constant 0 : i32
    return %c0_i32, %c0_i32_0 : i32, i32
  }
  func.func @transform_6(%arg0: i32) -> (i32, i32) {
    %c0_i32 = arith.constant 0 : i32
    %c0_i32_0 = arith.constant 0 : i32
    %c0_i32_1 = arith.constant 0 : i32
    return %c0_i32, %c0_i32_0 : i32, i32
  }
  func.func @transform_7(%arg0: i32) -> (i32, i32) {
    %c0_i32 = arith.constant 0 : i32
    %c0_i32_0 = arith.constant 0 : i32
    %c0_i32_1 = arith.constant 0 : i32
    return %c0_i32, %c0_i32_0 : i32, i32
  }
  func.func @transform_8(%arg0: i32) -> (i32, i32) {
    %c0_i32 = arith.constant 0 : i32
    %c0_i32_0 = arith.constant 0 : i32
    %c0_i32_1 = arith.constant 0 : i32
    return %c0_i32, %c0_i32_0 : i32, i32
  }
  func.func @transform_9(%arg0: i32) -> (i32, i32) {
    %c0_i32 = arith.constant 0 : i32
    %c0_i32_0 = arith.constant 0 : i32
    %c0_i32_1 = arith.constant 0 : i32
    return %c0_i32, %c0_i32_0 : i32, i32
  }
  func.func @transform_10(%arg0: i32) -> (i32, i32) {
    %c0_i32 = arith.constant 0 : i32
    %c0_i32_0 = arith.constant 0 : i32
    %c0_i32_1 = arith.constant 0 : i32
    return %c0_i32, %c0_i32_0 : i32, i32
  }
  func.func @transform_11(%arg0: i32) -> (i32, i32) {
    %c0_i32 = arith.constant 0 : i32
    %c0_i32_0 = arith.constant 0 : i32
    %c0_i32_1 = arith.constant 0 : i32
    return %c0_i32, %c0_i32_0 : i32, i32
  }
  func.func @transform_12(%arg0: i32) -> (i32, i32) {
    %c0_i32 = arith.constant 0 : i32
    %c0_i32_0 = arith.constant 0 : i32
    %c0_i32_1 = arith.constant 0 : i32
    return %c0_i32, %c0_i32_0 : i32, i32
  }
  func.func @transform_13(%arg0: i32) -> (i32, i32) {
    %c0_i32 = arith.constant 0 : i32
    %c0_i32_0 = arith.constant 0 : i32
    %c0_i32_1 = arith.constant 0 : i32
    return %c0_i32, %c0_i32_0 : i32, i32
  }
  func.func @transform_14(%arg0: i32) -> (i32, i32) {
    %c0_i32 = arith.constant 0 : i32
    %c0_i32_0 = arith.constant 0 : i32
    %c0_i32_1 = arith.constant 0 : i32
    return %c0_i32, %c0_i32_0 : i32, i32
  }
  func.func @transform_15(%arg0: i32) -> (i32, i32) {
    %c0_i32 = arith.constant 0 : i32
    %c0_i32_0 = arith.constant 0 : i32
    %c0_i32_1 = arith.constant 0 : i32
    return %c0_i32, %c0_i32_0 : i32, i32
  }
  func.func @transform_16(%arg0: i32) -> (i32, i32) {
    %c0_i32 = arith.constant 0 : i32
    %c0_i32_0 = arith.constant 0 : i32
    %c0_i32_1 = arith.constant 0 : i32
    return %c0_i32, %c0_i32_0 : i32, i32
  }
  func.func @transform_17(%arg0: i32) -> (i32, i32) {
    %c0_i32 = arith.constant 0 : i32
    %c0_i32_0 = arith.constant 0 : i32
    return %arg0, %c0_i32 : i32, i32
  }
}

</mosaic_0001>

<bundles_post_ra>
// kernel: bodyreg_branch.1
= control target key start
LH: loop header
LB: loop body
LE: loop exit
PB: predicated region body
PF: predicated region fallthrough
CT: control target
= control target key end

     0   :  { %s1776_s0 = inlined_call_operand.vmem [shape: bf16[16,32], index: 0, kind: input, shape index: {}]   ;;  %s1777_s1 = inlined_call_operand.vmem [shape: bf16[32,64], index: 1, kind: input, shape index: {}]   ;;  %s1778_s2 = inlined_call_operand.vmem [shape: f32[1,64], index: 2, kind: input, shape index: {}]   ;;  %s1779_s3 = inlined_call_operand.vmem [shape: f32[1,64], index: 3, kind: input, shape index: {}]   ;;  %s1780_s4 = inlined_call_operand.vmem [shape: f32[1,64], index: 4, kind: input, shape index: {}]   ;;  %s1781_s5 = inlined_call_operand.vmem [shape: bf16[64,256], index: 5, kind: input, shape index: {}]   ;;  %s1782_s6 = inlined_call_operand.vmem [shape: f32[1,256], index: 6, kind: input, shape index: {}]   ;;  %s1783_s7 = inlined_call_operand.vmem [shape: f32[1,256], index: 7, kind: input, shape index: {}]   ;;  %s1784_s8 = inlined_call_operand.vmem [shape: f32[1,256], index: 8, kind: input, shape index: {}]   ;;  %s1785_s9 = inlined_call_operand.vmem [shape: bf16[128,128], index: 9, kind: input, shape index: {}]   ;;  %s1786_s10 = inlined_call_operand.vmem [shape: f32[1,128], index: 10, kind: input, shape index: {}]   ;;  %s1787_s11 = inlined_call_operand.vmem [shape: f32[1,128], index: 11, kind: input, shape index: {}]   ;;  %s1788_s12 = inlined_call_operand.vmem [shape: f32[1,128], index: 12, kind: input, shape index: {}]   ;;  %s1789_s13 = inlined_call_operand.vmem [shape: bf16[128,128], index: 13, kind: input, shape index: {}]   ;;  %s1790_s14 = inlined_call_operand.vmem [shape: f32[1,128], index: 14, kind: input, shape index: {}]   ;;  %s1791_s15 = inlined_call_operand.vmem [shape: f32[1,128], index: 15, kind: input, shape index: {}]   ;;  %s1792_s16 = inlined_call_operand.vmem [shape: f32[1,128], index: 16, kind: input, shape index: {}]   ;;  %s1793_s17 = inlined_call_operand.hbm [shape: f32[16,64], index: 17, kind: output, shape index: {}]  }
   0x1   :  { %1798 = sst [smem:[#allocation8_spill]] %s1776_s0 }
   0x2   :  { %1799 = sst [smem:[#allocation9_spill]] %s1777_s1 }
   0x3   :  { %1800 = sst [smem:[#allocation10_spill]] %s1778_s2 }
   0x4   :  { %1801 = sst [smem:[#allocation11_spill]] %s1779_s3 }
   0x5   :  { %1802 = sst [smem:[#allocation12_spill]] %s1780_s4 }
   0x6   :  { %22 = vsyncpa [#allocation3], 0 }
   0x7   :  { %24 = vsyncpa [#allocation3 + $0x1], 0  ;;  %s1529_s24 = smov 0   ;;  %s1531_s25 = smov 0  }
   0x8   :  { %s1533_s26 = smov 0   ;;  %s1535_s27 = smov 0  }
   0x9 LB: > { %1803 = sst [smem:[#allocation5_spill]] %s1428_s26  ;;  %s1550_s28 = sadd.s32 4294967295, %s1432_s27   ;;  %s1432_s27 = sphi %s1535_s27, %s1813_s27   ;;  %s1428_s26 = sphi %s1533_s26, %s1818_s26   ;;  %s1424_s25 = sphi %s1531_s25, %s1817_s25   ;;  %s1420_s24 = sphi %s1529_s24, %s1816_s24  }
   0xa   : > { %s1173_s29 = sadd.s32 4294967294, %s1432_s27   ;;  %s1554_s0 = sadd.s32 1, %s1432_s27  }
   0xb   : > { %1804 = sst [smem:[#allocation6_spill]] %s1554_s0  ;;  %s399_s30 = sadd.s32 1, %s1428_s26 }
   0xc   : > { %s396_s18 = ssub.s32 %s1432_s27, %s1554_s0  ;;  %p409_p0 = scmp.ne.s32.totalorder %s1428_s26, %s1424_s25 }
   0xd   : > { %p397_p1 = scmp.eq.s32.totalorder %s396_s18, 0  ;;  %p410_p2 = scmp.eq.s32.totalorder %s1550_s28, 1 }
   0xe   : > { %p415_p3 = scmp.ne.s32.totalorder %s1424_s25, %s1420_s24  ;;  %p416_p4 = scmp.eq.s32.totalorder %s1173_s29, 1 }
   0xf   : > { %s1565_s19 = scalar_select %p397_p1, %s1428_s26, %s399_s30  }
  0x10   : > { %p1567_p5 = por %p410_p2, %p409_p0  ;;  %p1571_p6 = por %p416_p4, %p415_p3 }
  0x11   : > { %1805 = sst [smem:[#allocation7_spill]] %s1565_s19  ;;  %p1176_p7 = scmp.ge.s32.totalorder %s1432_s27, 1 }
  0x12   : > { %p489_p8 = scmp.lt.s32.totalorder %s1432_s27, 3 }
  0x14   : > { %p490_p9 = pnand %p1176_p7, %p489_p8 }
  0x15   : > { %s1808_s23 = sld [smem:[#allocation9_spill]] (!%p490_p9)  ;;  %v1434_v1 = vmov (!%p490_p9), 0.0   ;;  %vm1435_vm0 = vmmov (!%p490_p9), 0   ;;  %p540_p10 = scmp.lt.s32.totalorder (!%p490_p9), %s1550_s28, 1  ;;  %vm571_vm1 = vcmask (!%p490_p9), 261120   ;;  %vm615_vm2 = vcmask (!%p490_p9), 523264  }
  0x16   : > { %493 = sbr.rel (%p490_p9) target bundleno = 1732 (0x6c4), region = 88  ;;  %1241 = vmatprep.subr.bf16.mxu0 (!%p490_p9), %v1434_v1  ;;  %1245 = vmatprep.mubr.msk.bf16.mxu0 (!%p490_p9), %vm1435_vm0, %v1434_v1  ;;  %s1809_s26 = sld [smem:[#allocation8_spill]] (!%p490_p9)  ;;  %v1334_v13 = vld [vmem:[%s1781_s5 + $0x4] ss:$8 sps:$4 sm:$0xff] (!%p490_p9)   ;;  %v1336_v14 = vld [vmem:[%s1781_s5] ss:$8 sps:$4 sm:$0xff] (!%p490_p9)   ;;  %v661_v40 = vlaneseq (!%p490_p9) }
  0x17   : > { %s1810_s2 = sld [smem:[#allocation10_spill]] (!%p490_p9)  ;;  %v1337_v15 = vld [vmem:[%s1781_s5 + $0x14] ss:$8 sps:$4 sm:$0xff] (!%p490_p9)   ;;  %714 = vmatprep.subr.bf16.mxu1 (!%p490_p9), %v1334_v13  ;;  %v1339_v16 = vld [vmem:[%s1781_s5 + $0x10] ss:$8 sps:$4 sm:$0xff] (!%p490_p9)   ;;  %v1436_v17 = vmov (!%p490_p9), 0  }
  0x18   : > { %715 = vmatpush1.bf16.msra.mxu1 (!%p490_p9), %v1336_v14  ;;  %746 = vmatprep.mubr.bf16.mxu1 (!%p490_p9), %v1436_v17  ;;  %v1340_v18 = vld [vmem:[%s1781_s5 + $0x24] ss:$8 sps:$4 sm:$0xff] (!%p490_p9)   ;;  %v1342_v19 = vld [vmem:[%s1781_s5 + $0x20] ss:$8 sps:$4 sm:$0xff] (!%p490_p9)   ;;  %v1343_v20 = vld [vmem:[%s1781_s5 + $0x34] ss:$8 sps:$4 sm:$0xff] (!%p490_p9)  }
  0x19   : > { %716 = vmatprep.subr.bf16.mxu1 (!%p490_p9), %v1337_v15  ;;  %v1345_v21 = vld [vmem:[%s1781_s5 + $0x30] ss:$8 sps:$4 sm:$0xff] (!%p490_p9)   ;;  %s1811_s3 = sld [smem:[#allocation11_spill]] (!%p490_p9)  ;;  %s1812_s4 = sld [smem:[#allocation12_spill]] (!%p490_p9)  ;;  %v662_v41 = vshrl.u32 (!%p490_p9), %v661_v40, 7  ;;  %v1346_v57 = vld [vmem:[%s1785_s9] sm:$0xff] (!%p490_p9)  }
  0x1a   : > { %v657_v43 = vld [vmem:[%s1782_s6] sm:$0x3] (!%p490_p9)  ;;  %v1347_v58 = vld [vmem:[%s1785_s9 + $0x8] sm:$0xff] (!%p490_p9)   ;;  %v1348_v59 = vld [vmem:[%s1785_s9 + $0x10] sm:$0xff] (!%p490_p9)   ;;  %s537_s30 = sand.u32 (!%p490_p9), 1, %s1424_s25  }
  0x1b   : > { %v1332_v0 = vld [vmem:[%s1808_s23] sm:$0xff] (!%p490_p9)   ;;  %v1333_v2 = vld [vmem:[%s1808_s23 + $0x8] sm:$0xff] (!%p490_p9)   ;;  %v1634_v42 = vsub.s32 (!%p490_p9), 0, %v662_v41  ;;  %v667_v44 = vsub.s32 (!%p490_p9), 1, %v662_v41  ;;  %v1349_v60 = vld [vmem:[%s1785_s9 + $0x18] sm:$0xff] (!%p490_p9)   ;;  %s1101_s29 = scalar_lea.sflag (!%p490_p9), [#allocation3], %s537_s30 }
  0x1c   : > { %1242 = vmatpush3.bf16.msra.mxu0 (!%p490_p9), %v1332_v0  ;;  %717 = vmatpush1.bf16.msra.mxu1 (!%p490_p9), %v1339_v16  ;;  %v1350_v61 = vld [vmem:[%s1785_s9 + $0x20] sm:$0xff] (!%p490_p9)   ;;  %v1351_v62 = vld [vmem:[%s1785_s9 + $0x28] sm:$0xff] (!%p490_p9)   ;;  %v1352_v63 = vld [vmem:[%s1785_s9 + $0x30] sm:$0xff] (!%p490_p9)  }
  0x1d   : > { %1243 = vmatprep.subr.bf16.mxu0 %v1434_v1  ;;  %s541_s18 = scalar_select %p540_p10, %s1550_s28, 1  ;;  %v1179_v4 = vld [vmem:[%s1810_s2] ss:$0 sm:$0xff]  ;;  %718 = vmatprep.subr.bf16.mxu1 %v1340_v18  ;;  %v664_v45 = vrot.slane %v657_v43, %v1634_v42  ;;  %v668_v46 = vrot.slane %v657_v43, %v667_v44  ;;  %v1353_v0 = vld [vmem:[%s1785_s9 + $0x38] sm:$0xff]   ;;  %v1356_v40 = vld [vmem:[%s1789_s13 + $0x10] sm:$0xff]  }
  0x1e   : > { %v1357_v41 = vld [vmem:[%s1789_s13 + $0x18] sm:$0xff]   ;;  %v1359_v43 = vld [vmem:[%s1789_s13 + $0x28] sm:$0xff]   ;;  %s1437_s2 = smov 64  }
  0x1f   : > { %s1178_s21 = sshll.u32 %s541_s18, 2  ;;  %v1183_v32 = vld [vmem:[%s1811_s3] ss:$0 sm:$0xff] }
  0x20   : > { %1244 = vmatpush3.bf16.msra.mxu0 %v1333_v2  ;;  %s543_s0 = scalar_lea.vmem %s1809_s26, %s1178_s21  ;;  %719 = vmatpush1.bf16.msra.mxu1 %v1342_v19  ;;  %v1184_v34 = vld [vmem:[%s1812_s4] ss:$0 sm:$0xff]  ;;  %s1177_s26 = sshll.u32 %s537_s30, 3 }
  0x21   : > { %1249 = vmatprep.subr.bf16.mxu0 %v1434_v1  ;;  %v545_v3 = vld [vmem:[%s543_s0] sm:$0xf]  ;;  %720 = vmatprep.subr.bf16.mxu1 %v1343_v20  ;;  %s1217_s0 = sshll.u32 %s1550_s28, 7  ;;  %s539_s19 = scalar_lea.vmem [#allocation2], %s1177_s26 }
  0x22   : > { %s1114_s3 = sshll.u32 %s539_s19, 4  ;;  %s1733_s22 = scalar_lea.hbm %s1793_s17, %s1217_s0  ;;  %s1735_s3 = int_to_ptr.vmem [resolvable:$true] %s1114_s3 }
  0x23   : > { %1246 = vmatmul.mubr.msk.bf16.vlgmr.msra.gmra.mrb[0].mxu0 %vm571_vm1, %v545_v3  ;;  %s1438_s28 = smov [#allocation2]  }
  0x24   : > { %1265 = vmatprep.mubr.msk.bf16.mxu0 %vm1435_vm0, %v1434_v1  ;;  %721 = vmatpush1.bf16.msra.mxu1 %v1345_v21  ;;  %s1374_s26 = sshll.u32 %s1438_s28, 4  ;;  %s1375_s26 = int_to_ptr.vmem [resolvable:$false] %s1374_s26 }
  0x25   : > { %1269 = vmatprep.subr.bf16.mxu1 %v1434_v1  ;;  %1250 = vmatpush3.bf16.msra.mxu0 %v1346_v57  ;;  %s1376_s4 = scalar_lea.vmem %s1375_s26, 256  ;;  %p1377_p0 = scmp.lt.s32.totalorder %s1735_s3, %s1375_s26 }
  0x26   : > { %1251 = vmatprep.subr.bf16.mxu0 %v1434_v1 }
  0x29   : > { %1252 = vmatpush3.bf16.msra.mxu0 %v1347_v58 }
  0x2a   : > { %1253 = vmatprep.subr.bf16.mxu0 %v1434_v1 }
  0x2d   : > { %1254 = vmatpush3.bf16.msra.mxu0 %v1348_v59 }
  0x2e   : > { %1255 = vmatprep.subr.bf16.mxu0 %v1434_v1 }
  0x31   : > { %1256 = vmatpush3.bf16.msra.mxu0 %v1349_v60 }
  0x32   : > { %1257 = vmatprep.subr.bf16.mxu0 %v1434_v1 }
  0x35   : > { %1258 = vmatpush3.bf16.msra.mxu0 %v1350_v61 }
  0x36   : > { %1259 = vmatprep.subr.bf16.mxu0 %v1434_v1 }
  0x39   : > { %1260 = vmatpush3.bf16.msra.mxu0 %v1351_v62 }
  0x3a   : > { %1261 = vmatprep.subr.bf16.mxu0 %v1434_v1 }
  0x3d   : > { %1262 = vmatpush3.bf16.msra.mxu0 %v1352_v63  ;;  %v1205_v63 = vld [vmem:[%s1790_s14] ss:$0 sm:$0xff] }
  0x3e   : > { %1263 = vmatprep.subr.bf16.mxu0 %v1434_v1 }
  0x41   : > { %1264 = vmatpush3.bf16.msra.mxu0 %v1353_v0 }
  0xf6   : > { %v609_v5 = vpop.f32.mrb[0].mxu0 }
  0xf7   : > { %v610_v6 = vadd.f32 %v1179_v4, %v609_v5  ;;  %v1247_v7 = vpop.f32.mrb[1].mxu0 }
  0xf8   : > { %v612_v8 = vpop.f32.mrb[2].mxu0 }
  0xf9   : > { %v1248_v9 = vpop.f32.mrb[3].mxu0  ;;  %v616_v10 = vsel %vm615_vm2, %v610_v6, 0.0  ;;  %v620_v11 = vmul.f32 %v610_v6, %v610_v6 }
  0xfa   : > { %617 = vadd.xlane.f32.xlu0 %v616_v10  ;;  %v658_v10 = vld [vmem:[%s1783_s7] sm:$0x3] }
  0xfb   : > { %v621_v12 = vsel %vm615_vm2, %v620_v11, 0.0  ;;  %v659_v11 = vld [vmem:[%s1784_s8] sm:$0x3]  ;;  %v782_v13 = vrot.slane %v658_v10, %v667_v44 }
  0xfc   : > { %v791_v17 = vrot.slane %v659_v11, %v1634_v42  ;;  %v795_v18 = vrot.slane %v659_v11, %v667_v44  ;;  %v1360_v44 = vld [vmem:[%s1789_s13 + $0x30] sm:$0xff]  }
  0xfe   : > { %622 = vadd.xlane.f32.xlu0 %v621_v12  ;;  %v778_v12 = vrot.slane %v658_v10, %v1634_v42  ;;  %v1358_v42 = vld [vmem:[%s1789_s13 + $0x20] sm:$0xff]  }
 0x187   : > { %v618_v22 = vpop.xlane.xlu0 %617 }
 0x188   : > { %v619_v23 = vmul.f32 0.015625, %v618_v22 }
 0x18a   : > { %v625_v25 = vmul.f32 %v619_v23, %v619_v23  ;;  %v628_v30 = vsub.f32 %v610_v6, %v619_v23 }
 0x18b   : > { %v623_v24 = vpop.xlane.xlu0 %622 }
 0x18c   : > { %v624_v26 = vmul.f32 0.015625, %v623_v24 }
 0x18e   : > { %v626_v27 = vsub.f32 %v624_v26, %v625_v25 }
 0x190   : > { %v627_v28 = vmax.f32 %v626_v27, 0.0 }
 0x192   : > { %v629_v29 = vadd.f32 1e-05, %v627_v28 }
 0x194   : > { %1362 = vrsqrt.f32 %v629_v29 }
 0x19e   : > { %v1363_v31 = vpop.eup %1362 }
 0x19f   : > { %v631_v33 = vmul.f32 %v1363_v31, %v628_v30  ;;  %v1194_v31 = vld [vmem:[%s1786_s10] ss:$0 sm:$0xff] }
 0x1a1   : > { %v638_v35 = vmul.f32 %v1183_v32, %v631_v33 }
 0x1a3   : > { %v645_v36 = vadd.f32 %v1184_v34, %v638_v35 }
 0x1a5   : > { %v646_v37 = vmul.f32 0.2, %v645_v36 }
 0x1a7   : > { %v647_v38 = vmax.f32 %v645_v36, %v646_v37 }
 0x1a9   : > { %v648_v39 = vpack.c.bf16 %v647_v38, %v647_v38  ;;  %v1354_v38 = vld [vmem:[%s1789_s13] sm:$0xff]  }
 0x1ab   : > { %1193 = vmatmul.mubr.msk.bf16.vlgmr.msra.gmra.mrb[0].mxu1 %vm615_vm2, %v648_v39  ;;  %v1355_v39 = vld [vmem:[%s1789_s13 + $0x8] sm:$0xff]  }
 0x1ac   : > { %1285 = vmatprep.mubr.msk.bf16.mxu1 %vm1435_vm0, %v1434_v1  ;;  %1270 = vmatpush3.bf16.msra.mxu1 %v1354_v38 }
 0x1ad   : > { %1271 = vmatprep.subr.bf16.mxu1 %v1434_v1 }
 0x1b0   : > { %1272 = vmatpush3.bf16.msra.mxu1 %v1355_v39 }
 0x1b1   : > { %1273 = vmatprep.subr.bf16.mxu1 %v1434_v1 }
 0x1b4   : > { %1274 = vmatpush3.bf16.msra.mxu1 %v1356_v40 }
 0x1b5   : > { %1275 = vmatprep.subr.bf16.mxu1 %v1434_v1 }
 0x1b8   : > { %1276 = vmatpush3.bf16.msra.mxu1 %v1357_v41 }
 0x1b9   : > { %1277 = vmatprep.subr.bf16.mxu1 %v1434_v1 }
 0x1bc   : > { %1278 = vmatpush3.bf16.msra.mxu1 %v1358_v42 }
 0x1bd   : > { %1279 = vmatprep.subr.bf16.mxu1 %v1434_v1 }
 0x1c0   : > { %1280 = vmatpush3.bf16.msra.mxu1 %v1359_v43 }
 0x1c1   : > { %1281 = vmatprep.subr.bf16.mxu1 %v1434_v1 }
 0x1c4   : > { %1282 = vmatpush3.bf16.msra.mxu1 %v1360_v44 }
 0x1c5   : > { %1283 = vmatprep.subr.bf16.mxu1 %v1434_v1  ;;  %v1204_v1 = vld [vmem:[%s1788_s12] ss:$0 sm:$0xff] }
 0x27e   : > { %v748_v47 = vpop.f32.mrb[0].mxu1 }
 0x27f   : > { %v749_v48 = vadd.f32 %v748_v47, %v664_v45  ;;  %v750_v49 = vpop.f32.mrb[1].mxu1  ;;  %v1361_v45 = vld [vmem:[%s1789_s13 + $0x38] sm:$0xff]  }
 0x280   : > { %v751_v50 = vadd.f32 %v750_v49, %v668_v46  ;;  %v752_v51 = vpop.f32.mrb[2].mxu1  ;;  %1284 = vmatpush3.bf16.msra.mxu1 %v1361_v45 }
 0x281   : > { %v753_v52 = vpop.f32.mrb[3].mxu1  ;;  %v759_v54 = vmul.f32 %v749_v48, %v749_v48 }
 0x282   : > { %v755_v53 = vadd.f32 %v751_v50, %v749_v48  ;;  %v760_v55 = vmul.f32 %v751_v50, %v751_v50 }
 0x284   : > { %756 = vadd.xlane.f32.xlu1 %v755_v53  ;;  %v761_v56 = vadd.f32 %v760_v55, %v759_v54 }
 0x288   : > { %762 = vadd.xlane.f32.xlu1 %v761_v56  ;;  %v1203_v56 = vld [vmem:[%s1787_s11] ss:$0 sm:$0xff] }
 0x311   : > { %v757_v2 = vpop.xlane.xlu1 %756 }
 0x312   : > { %v758_v3 = vmul.f32 0.00390625, %v757_v2 }
 0x314   : > { %v765_v5 = vmul.f32 %v758_v3, %v758_v3  ;;  %v768_v14 = vsub.f32 %v749_v48, %v758_v3  ;;  %v769_v15 = vsub.f32 %v751_v50, %v758_v3 }
 0x315   : > { %v763_v4 = vpop.xlane.xlu1 %762 }
 0x316   : > { %v764_v6 = vmul.f32 0.00390625, %v763_v4 }
 0x318   : > { %v766_v7 = vsub.f32 %v764_v6, %v765_v5 }
 0x31a   : > { %v767_v8 = vmax.f32 %v766_v7, 0.0 }
 0x31c   : > { %v770_v9 = vadd.f32 1e-05, %v767_v8 }
 0x31e   : > { %1364 = vrsqrt.f32 %v770_v9 }
 0x328   : > { %v1365_v16 = vpop.eup %1364 }
 0x329   : > { %v772_v19 = vmul.f32 %v1365_v16, %v768_v14  ;;  %v773_v20 = vmul.f32 %v1365_v16, %v769_v15 }
 0x32b   : > { %v785_v21 = vmul.f32 %v778_v12, %v772_v19  ;;  %v786_v22 = vmul.f32 %v782_v13, %v773_v20  ;;  %v1215_v19 = vld [vmem:[%s1792_s16] ss:$0 sm:$0xff] }
 0x32d   : > { %v798_v23 = vadd.f32 %v791_v17, %v785_v21  ;;  %v799_v24 = vadd.f32 %v795_v18, %v786_v22  ;;  %v1214_v17 = vld [vmem:[%s1791_s15] ss:$0 sm:$0xff] }
 0x32f   : > { %v800_v25 = vmul.f32 0.2, %v798_v23  ;;  %v801_v26 = vmul.f32 0.2, %v799_v24 }
 0x331   : > { %v802_v27 = vmax.f32 %v798_v23, %v800_v25  ;;  %v803_v28 = vmax.f32 %v799_v24, %v801_v26 }
 0x333   : > { %v804_v29 = vmax.f32 %v802_v27, %v803_v28 }
 0x335   : > { %v805_v30 = vpack.c.bf16 %v804_v29, %v804_v29 }
 0x337   : > { %1266 = vmatmul.mubr.bf16.vlgmr.msra.gmra.mrb[4].mxu0 %v805_v30 }
 0x40a   : > { %v913_v32 = vpop.f32.mrb[4].mxu0 }
 0x40b   : > { %v914_v33 = vadd.f32 %v1194_v31, %v913_v32  ;;  %v1267_v34 = vpop.f32.mrb[5].mxu0 }
 0x40c   : > { %v916_v35 = vpop.f32.mrb[6].mxu0 }
 0x40d   : > { %919 = vadd.xlane.f32.xlu0 %v914_v33  ;;  %v1268_v36 = vpop.f32.mrb[7].mxu0  ;;  %v922_v37 = vmul.f32 %v914_v33, %v914_v33 }
 0x40f   : > { %923 = vadd.xlane.f32.xlu1 %v922_v37 }
 0x49a   : > { %v920_v46 = vpop.xlane.xlu0 %919 }
 0x49b   : > { %v921_v47 = vmul.f32 0.0078125, %v920_v46 }
 0x49c   : > { %v924_v48 = vpop.xlane.xlu1 %923 }
 0x49d   : > { %v926_v49 = vmul.f32 %v921_v47, %v921_v47  ;;  %v925_v50 = vmul.f32 0.0078125, %v924_v48  ;;  %v929_v54 = vsub.f32 %v914_v33, %v921_v47 }
 0x49f   : > { %v927_v51 = vsub.f32 %v925_v50, %v926_v49 }
 0x4a1   : > { %v928_v52 = vmax.f32 %v927_v51, 0.0 }
 0x4a3   : > { %v930_v53 = vadd.f32 1e-05, %v928_v52 }
 0x4a5   : > { %1366 = vrsqrt.f32 %v930_v53 }
 0x4af   : > { %v1367_v55 = vpop.eup %1366 }
 0x4b0   : > { %v932_v57 = vmul.f32 %v1367_v55, %v929_v54 }
 0x4b2   : > { %v939_v58 = vmul.f32 %v1203_v56, %v932_v57 }
 0x4b4   : > { %v946_v59 = vadd.f32 %v1204_v1, %v939_v58 }
 0x4b6   : > { %v947_v60 = vmul.f32 0.2, %v946_v59 }
 0x4b8   : > { %v948_v61 = vmax.f32 %v946_v59, %v947_v60 }
 0x4ba   : > { %v949_v62 = vpack.c.bf16 %v948_v61, %v948_v61 }
 0x4bc   : > { %1286 = vmatmul.mubr.bf16.vlgmr.msra.gmra.mrb[4].mxu1 %v949_v62 }
 0x58f   : > { %v1057_v0 = vpop.f32.mrb[4].mxu1 }
 0x590   : > { %v1058_v2 = vadd.f32 %v1205_v63, %v1057_v0  ;;  %v1287_v3 = vpop.f32.mrb[5].mxu1 }
 0x591   : > { %v1060_v4 = vpop.f32.mrb[6].mxu1 }
 0x592   : > { %1063 = vadd.xlane.f32.xlu0 %v1058_v2  ;;  %v1288_v5 = vpop.f32.mrb[7].mxu1  ;;  %v1066_v6 = vmul.f32 %v1058_v2, %v1058_v2 }
 0x594   : > { %1067 = vadd.xlane.f32.xlu1 %v1066_v6 }
 0x61f   : > { %v1064_v7 = vpop.xlane.xlu0 %1063 }
 0x620   : > { %v1065_v8 = vmul.f32 0.0078125, %v1064_v7 }
 0x621   : > { %v1068_v9 = vpop.xlane.xlu1 %1067 }
 0x622   : > { %v1070_v10 = vmul.f32 %v1065_v8, %v1065_v8  ;;  %v1069_v11 = vmul.f32 0.0078125, %v1068_v9  ;;  %v1073_v15 = vsub.f32 %v1058_v2, %v1065_v8 }
 0x624   : > { %v1071_v12 = vsub.f32 %v1069_v11, %v1070_v10 }
 0x626   : > { %v1072_v13 = vmax.f32 %v1071_v12, 0.0 }
 0x628   : > { %v1074_v14 = vadd.f32 1e-05, %v1072_v13 }
 0x62a   : > { %1368 = vrsqrt.f32 %v1074_v14 }
 0x634   : > { %v1369_v16 = vpop.eup %1368 }
 0x635   : > { %v1076_v18 = vmul.f32 %v1369_v16, %v1073_v15 }
 0x637   : > { %v1083_v20 = vmul.f32 %v1214_v17, %v1076_v18 }
 0x639   : > { %v1090_v21 = vadd.f32 %v1215_v19, %v1083_v20 }
 0x63b   : > { %v1091_v22 = vmul.f32 0.2, %v1090_v21 }
 0x63d   : > { %v1092_v23 = vmax.f32 %v1090_v21, %v1091_v22 }
 0x63f   : > { %1094 = vrot.lane.b32.xlu0 %v1092_v23, %s1437_s2  ;;  %s1370_s2 = scalar_lea.vmem %s1735_s3, 128 }
 0x640   : > { %p1371_p11 = scmp.ne.s32.totalorder %s1735_s3, %s1370_s2  ;;  %p1378_p1 = scmp.lt.s32.totalorder %s1376_s4, %s1370_s2 }
 0x642   : > { %p1372_p12 = pnand %p1371_p11, %p1567_p5  ;;  %p1379_p2 = por %p1378_p1, %p1377_p0 }
 0x644   : > { %p1373_p13 = pneg %p1372_p12 }
 0x646   : > { %p1380_p3 = pnand %p1379_p2, %p1373_p13 }
 0x6b1   : > { %v1095_v24 = vpop.permute.xlu0 %1094 }
 0x6b2   : > { %v1097_v25 = vadd.f32 %v1095_v24, %v1092_v23 }
 0x6b4   : > { %v1098_v26 = vmul.f32 0.5, %v1097_v25 }
 0x6b6   : > { %1099 = vst.msk [vmem:[%s539_s19] sm:$0xff] %vm615_vm2, %v1098_v26 }
 0x6b7   : > { %1383 = shalt.err (!%p1380_p3)
}
 0x6b8   : > { %s1384_s30 = scalar_lea.hbm %s1733_s22, 128  ;;  %s1388_s18 = scalar_lea.hbm %s1793_s17, 256 }
 0x6b9   : > { %p1385_p4 = scmp.ne.s32.totalorder %s1733_s22, %s1384_s30  ;;  %p1389_p9 = scmp.lt.u32.totalorder %s1733_s22, %s1793_s17 }
 0x6ba   : > { %p1390_p10 = scmp.lt.u32.totalorder %s1388_s18, %s1384_s30  ;;  %p1392_p12 = scmp.lt.u32.totalorder %s1384_s30, %s1733_s22 }
 0x6bb   : > { %p1386_p7 = pnand %p1385_p4, %p1567_p5 }
 0x6bc   : > { %p1391_p11 = por %p1390_p10, %p1389_p9 }
 0x6bd   : > { %p1387_p8 = pneg %p1386_p7 }
 0x6be   : > { %p1393_p13 = por %p1392_p12, %p1391_p11 }
 0x6c0   : > { %p1394_p0 = pnand %p1393_p13, %p1387_p8 }
 0x6c2   : > { %1397 = shalt.err (!%p1394_p0)
}
 0x6c3   : > { %1289 = dma.vmem_to_hbm [thread:$0]  (%p1567_p5), %s1735_s3, 128, %s1733_s22, %s1101_s29  }
 0x6c4 PF: > { %p1295_p1 = scmp.ge.s32.totalorder %s1432_s27, 2  ;;  %s1126_s4 = sand.u32 1, %s1420_s24  }
 0x6c5   : > { %s1127_s2 = scalar_lea.sflag [#allocation3], %s1126_s4 }
 0x6c6   : > { %p1292_p2 = pnand %p1295_p1, %p1571_p6 }
 0x6c8   : > { %1415 = dma.done.wait (!%p1292_p2), %s1127_s2, 128  }
 0x6c9   : > { %1417 = vsyncadd (!%p1292_p2), %s1127_s2, 4294967168  ;;  %s1813_s27 = sld [smem:[#allocation6_spill]]  ;;  %s1814_s26 = sld [smem:[#allocation5_spill]] }
 0x6ca   : > { %s1815_s30 = sld [smem:[#allocation7_spill]]  ;;  %s1816_s24 = smov %s1424_s25 }
 0x6cf   : > { %p27_p3 = scmp.ge.s32.totalorder %s1813_s27, 4   ;;  %s1817_s25 = smov %s1814_s26 }
 0x6d0   : > { %s1818_s26 = smov %s1815_s30 }
 0x6d1   :  { %29 = sbr.rel (!%p27_p3) target bundleno = 9 (0x9), region = 123 }
 0x6d8   :  { %1132 = vsyncpa [#allocation3], 1 }
 0x6d9   :  { %1134 = vsyncpa [#allocation3 + $0x1], 1 }

</bundles_post_ra>
